<compile_context>
chip_gen: v6e
topology: v6e:2x2x1
jax: 0.10.0
libtpu: 0.0.40
codegen_flags: <defaults>
</compile_context>

<pallas_src>
import jax
import jax.numpy as jnp
from jax.experimental import pallas as pl
from jax.experimental.pallas import tpu as pltpu


def _round_up(x, m):
    return (x + m - 1) // m * m


# ------------------------------ Pallas kernels ----------------------------- #
def _svd_lowrank_kernel(x_ref, u_ref, v_ref, b_ref, o_ref, o1_ref):
    """grid = (batch-tile i, d_out-tile j); j is innermost.

    At j == 0 compute o1 = x_tile @ U_k once per batch tile into a bf16 VMEM
    scratch, then reuse it for every d_out tile:
        out[i, j] = o1 @ Vs[:, j*tn:(j+1)*tn] + bias[j]
    Both matmuls run on the MXU with bf16 operands and f32 accumulation.
    """
    j = pl.program_id(1)

    @pl.when(j == 0)
    def _():
        o1 = jnp.dot(x_ref[...], u_ref[...], preferred_element_type=jnp.float32)
        o1_ref[...] = o1.astype(o1_ref.dtype)

    o2 = jnp.dot(o1_ref[...], v_ref[...], preferred_element_type=jnp.float32)
    o_ref[...] = (o2 + b_ref[...].astype(jnp.float32)).astype(o_ref.dtype)


def _dense_linear_kernel(x_ref, w_ref, b_ref, o_ref):
    """Fused path: out[i, j] = x_tile @ W'[:, j] + bias[j] (single matmul)."""
    acc = jnp.dot(x_ref[...], w_ref[...], preferred_element_type=jnp.float32)
    o_ref[...] = (acc + b_ref[...].astype(jnp.float32)).astype(o_ref.dtype)


# ------------------------------ Pallas wrappers ----------------------------- #
def svded_linear_lowrank(x, U_k, Vs, b, *, tm=256, tn=128,
                         vmem_limit_bytes=64 * 1024 * 1024):
    """y = (x @ U_k) @ Vs + b via the two-stage (low-rank) Pallas kernel."""
    N, d_in = x.shape
    k = U_k.shape[1]
    d_out = Vs.shape[1]
    out_dtype = x.dtype

    # Tile / pad to MXU- and lane-friendly sizes (zeros do not change the dots).
    tm = min(tm, _round_up(N, 8))                 # batch tile, multiple of 8
    d_in_p = _round_up(d_in, 128)
    k_p = _round_up(max(k, 1), 128)
    d_out_p = _round_up(d_out, tn)                # tn is a multiple of 128
    N_p = _round_up(N, tm)

    x_p = jnp.pad(x.astype(jnp.bfloat16), ((0, N_p - N), (0, d_in_p - d_in)))
    u_p = jnp.pad(U_k.astype(jnp.bfloat16), ((0, d_in_p - d_in), (0, k_p - k)))
    v_p = jnp.pad(Vs.astype(jnp.bfloat16), ((0, k_p - k), (0, d_out_p - d_out)))
    b_p = jnp.pad(b.astype(jnp.float32), (0, d_out_p - d_out)).reshape(1, d_out_p)

    grid = (N_p // tm, d_out_p // tn)
    flops = 2 * N_p * d_in_p * k_p + 2 * N_p * k_p * d_out_p
    bytes_accessed = ((x_p.size + u_p.size + v_p.size) * 2 + b_p.size * 4
                      + N_p * d_out_p * jnp.dtype(out_dtype).itemsize)

    out = pl.pallas_call(
        _svd_lowrank_kernel,
        out_shape=jax.ShapeDtypeStruct((N_p, d_out_p), out_dtype),
        grid_spec=pltpu.PrefetchScalarGridSpec(
            num_scalar_prefetch=0,
            grid=grid,
            in_specs=[
                pl.BlockSpec((tm, d_in_p), lambda i, j: (i, 0)),   # x batch tile
                # U_k resident (constant index). For very large k, tile k as
                # well (extra reduction axis + f32 accumulator scratch).
                pl.BlockSpec((d_in_p, k_p), lambda i, j: (0, 0)),
                pl.BlockSpec((k_p, tn), lambda i, j: (0, j)),      # Vs d_out tile
                pl.BlockSpec((1, tn), lambda i, j: (0, j)),        # bias tile
            ],
            out_specs=pl.BlockSpec((tm, tn), lambda i, j: (i, j)),
            scratch_shapes=[pltpu.VMEM((tm, k_p), jnp.bfloat16)],  # o1, reused over j
        ),
        compiler_params=pltpu.CompilerParams(
            dimension_semantics=("parallel", "arbitrary"),
            vmem_limit_bytes=vmem_limit_bytes,
        ),
        cost_estimate=pl.CostEstimate(
            flops=flops, transcendentals=0, bytes_accessed=bytes_accessed),
    )(x_p, u_p, v_p, b_p)
    return out[:N, :d_out]


def svded_linear_dense(x, W2, b, *, tm=256, tn=128,
                       vmem_limit_bytes=64 * 1024 * 1024):
    """y = x @ W2 + b (fused path where W2 = U_k @ Vs was pre-multiplied)."""
    N, d_in = x.shape
    d_out = W2.shape[1]
    out_dtype = x.dtype

    tm = min(tm, _round_up(N, 8))
    d_in_p = _round_up(d_in, 128)
    d_out_p = _round_up(d_out, tn)
    N_p = _round_up(N, tm)

    x_p = jnp.pad(x.astype(jnp.bfloat16), ((0, N_p - N), (0, d_in_p - d_in)))
    w_p = jnp.pad(W2.astype(jnp.bfloat16), ((0, d_in_p - d_in), (0, d_out_p - d_out)))
    b_p = jnp.pad(b.astype(jnp.float32), (0, d_out_p - d_out)).reshape(1, d_out_p)

    grid = (N_p // tm, d_out_p // tn)
    flops = 2 * N_p * d_in_p * d_out_p
    bytes_accessed = ((x_p.size + w_p.size) * 2 + b_p.size * 4
                      + N_p * d_out_p * jnp.dtype(out_dtype).itemsize)

    out = pl.pallas_call(
        _dense_linear_kernel,
        out_shape=jax.ShapeDtypeStruct((N_p, d_out_p), out_dtype),
        grid_spec=pltpu.PrefetchScalarGridSpec(
            num_scalar_prefetch=0,
            grid=grid,
            in_specs=[
                pl.BlockSpec((tm, d_in_p), lambda i, j: (i, 0)),
                pl.BlockSpec((d_in_p, tn), lambda i, j: (0, j)),
                pl.BlockSpec((1, tn), lambda i, j: (0, j)),
            ],
            out_specs=pl.BlockSpec((tm, tn), lambda i, j: (i, j)),
        ),
        compiler_params=pltpu.CompilerParams(
            dimension_semantics=("parallel", "parallel"),
            vmem_limit_bytes=vmem_limit_bytes,
        ),
        cost_estimate=pl.CostEstimate(
            flops=flops, transcendentals=0, bytes_accessed=bytes_accessed),
    )(x_p, w_p, b_p)
    return out[:N, :d_out]


def svded_linear_forward(x, U_k, Vs, b, *, fuse=None, **kw):
    """forward_svd: (x @ U_k) @ Vs + b.

    If the kept rank k is not below the break-even point
    k < d_in*d_out/(d_in+d_out) (e.g. reduce_rate=0.5 on a square layer), the
    two-stage form does the same FLOPs/bytes as a dense matmul plus overhead,
    so pre-multiply W' = U_k @ Vs once and run one fused matmul instead.
    """
    d_in, k = U_k.shape
    d_out = Vs.shape[1]
    if b is None:
        b = jnp.zeros((d_out,), jnp.float32)
    if fuse is None:
        fuse = k * (d_in + d_out) >= d_in * d_out
    if fuse:
        W2 = jnp.dot(U_k.astype(jnp.float32), Vs.astype(jnp.float32))
        return svded_linear_dense(x, W2, b, **kw)
    return svded_linear_lowrank(x, U_k, Vs, b, **kw)


# ---------------------- SVD factor setup (plain-JAX glue) ------------------- #
def build_svd_factors(W, b, reduce_rate):
    """Replicates SVDED_Linear.svd() on weight W (out, in) and bias b (out,)."""
    # torch.linalg.svd(self.weight.t()) -> U (in,in), S (min,), Vh (out,out)
    U_full, S, Vh = jnp.linalg.svd(W.T, full_matrices=True)
    order = jnp.argsort(S)                       # ascending
    U_full = U_full[:, order]
    S = S[order]
    Vh = Vh[order, :]                            # (min, out)

    r = int(S.shape[0] * reduce_rate)
    if r <= 0:
        # Mirrors the module's `if r <= 0: r = len(S)` (keeps zero components);
        # callers normally avoid this degenerate case by using reduce_rate > 0
        # such that int(min * reduce_rate) >= 1.
        r = S.shape[0]
    U_k = U_full[:, r:]                          # (in, k)
    Vh_k = Vh[r:, :]                             # (k, out)
    S_k = S[r:]                                  # (k,)

    # V[i] = V[i] * S[i][i]; since k <= out always, all k rows are scaled.
    Vs = Vh_k * S_k[:, None]                     # (k, out)
    return U_k, Vs, b


# ------------------------------------ main ---------------------------------- #
if __name__ == "__main__":
    key = jax.random.PRNGKey(0)
    kx, kw, kb, kx2, kw2, kb2 = jax.random.split(key, 6)

    # ---- low-rank path: reduce_rate=0.75 -> k well below break-even ----
    batch, in_features, out_features = 512, 256, 384
    reduce_rate = 0.75

    bound = 1.0 / (in_features ** 0.5)
    W = jax.random.uniform(kw, (out_features, in_features), jnp.float32,
                           minval=-bound, maxval=bound)
    b = jax.random.uniform(kb, (out_features,), jnp.float32,
                           minval=-bound, maxval=bound)
    x = jax.random.normal(kx, (batch, in_features), jnp.float32)

    U_k, Vs, bias = build_svd_factors(W, b, reduce_rate)   # k = 64 here
    y = jax.block_until_ready(svded_linear_forward(x, U_k, Vs, bias))
    assert y.shape == (batch, out_features)

    # Reference matched to the kernel's bf16-operand / f32-accumulate math.
    x_bf = x.astype(jnp.bfloat16).astype(jnp.float32)
    u_bf = U_k.astype(jnp.bfloat16).astype(jnp.float32)
    v_bf = Vs.astype(jnp.bfloat16).astype(jnp.float32)
    o1_ref = (x_bf @ u_bf).astype(jnp.bfloat16).astype(jnp.float32)
    y_ref = o1_ref @ v_bf + bias[None, :]
    assert jnp.allclose(y, y_ref, atol=1e-2, rtol=1e-2), "low-rank kernel mismatch"

    # ---- fused path: reduce_rate=0.5 on a square layer (k == break-even) ----
    batch2, n2 = 64, 128
    bound2 = 1.0 / (n2 ** 0.5)
    W2 = jax.random.uniform(kw2, (n2, n2), jnp.float32, minval=-bound2, maxval=bound2)
    b2 = jax.random.uniform(kb2, (n2,), jnp.float32, minval=-bound2, maxval=bound2)
    x2 = jax.random.normal(kx2, (batch2, n2), jnp.float32)

    U2, V2, bias2 = build_svd_factors(W2, b2, 0.5)
    y2 = jax.block_until_ready(svded_linear_forward(x2, U2, V2, bias2))  # auto-fuses
    Wf = (U2.astype(jnp.float32) @ V2.astype(jnp.float32))
    Wf_bf = Wf.astype(jnp.bfloat16).astype(jnp.float32)
    y2_ref = x2.astype(jnp.bfloat16).astype(jnp.float32) @ Wf_bf + bias2[None, :]
    assert y2.shape == (batch2, n2)
    assert jnp.allclose(y2, y2_ref, atol=1e-2, rtol=1e-2), "fused kernel mismatch"

    print("KERNEL_OK")
</pallas_src>

<mosaic_0001>
module attributes {stable_mosaic.version = 11 : i64} {
  func.func @_svd_lowrank_kernel(%arg0: i32, %arg1: i32, %arg2: memref<256x256xbf16, #tpu.memory_space<vmem>>, %arg3: memref<256x128xbf16, #tpu.memory_space<vmem>>, %arg4: memref<128x128xbf16, #tpu.memory_space<vmem>>, %arg5: memref<1x128xf32, #tpu.memory_space<vmem>>, %arg6: memref<256x128xf32, #tpu.memory_space<vmem>>, %arg7: memref<256x128xbf16, #tpu.memory_space<vmem>>) attributes {dimension_semantics = [#tpu.dimension_semantics<parallel>, #tpu.dimension_semantics<arbitrary>], iteration_bounds = array<i64: 2, 3>, scalar_prefetch = 0 : i64, scratch_operands = 1 : i64, tpu.core_type = #tpu.core_type<tc>, window_params = [{transform_indices = @transform_0, window_bounds = array<i64: 256, 256>}, {pipeline_mode = #tpu.pipeline_mode<synchronous>, transform_indices = @transform_1, window_bounds = array<i64: 256, 128>}, {transform_indices = @transform_2, window_bounds = array<i64: 128, 128>}, {transform_indices = @transform_3, window_bounds = array<i64: 1, 128>}, {transform_indices = @transform_4, window_bounds = array<i64: 256, 128>}]} {
    %c0_i32 = arith.constant 0 : i32
    %0 = arith.cmpi eq, %arg1, %c0_i32 : i32
    %1 = arith.extui %0 : i1 to i32
    %c0_i32_0 = arith.constant 0 : i32
    %2 = arith.cmpi ne, %1, %c0_i32_0 : i32
    scf.if %2 {
      %c0_8 = arith.constant 0 : index
      %c0_9 = arith.constant 0 : index
      %10 = vector.load %arg2[%c0_8, %c0_9] : memref<256x256xbf16, #tpu.memory_space<vmem>>, vector<256x256xbf16>
      %c0_10 = arith.constant 0 : index
      %c0_11 = arith.constant 0 : index
      %11 = vector.load %arg3[%c0_10, %c0_11] : memref<256x128xbf16, #tpu.memory_space<vmem>>, vector<256x128xbf16>
      %cst_12 = arith.constant dense<0.000000e+00> : vector<256x128xf32>
      %12 = tpu.matmul %10, %11, %cst_12 {dimension_numbers = #tpu.dot_dimension_numbers<[1], [0], [0], [1], [0, 0, 1, 1], [], []>} : vector<256x256xbf16>, vector<256x128xbf16>, vector<256x128xf32> -> vector<256x128xf32>
      %13 = arith.truncf %12 : vector<256x128xf32> to vector<256x128xbf16>
      %c0_13 = arith.constant 0 : index
      %c0_14 = arith.constant 0 : index
      %14 = vector.load %arg7[%c0_13, %c0_14] : memref<256x128xbf16, #tpu.memory_space<vmem>>, vector<256x128xbf16>
      tpu.vector_store %arg7[%c0_13, %c0_14], %13 {strides = array<i32>} : memref<256x128xbf16, #tpu.memory_space<vmem>>, vector<256x128xbf16>,
    } else {
    }
    %c0 = arith.constant 0 : index
    %c0_1 = arith.constant 0 : index
    %3 = vector.load %arg7[%c0, %c0_1] : memref<256x128xbf16, #tpu.memory_space<vmem>>, vector<256x128xbf16>
    %c0_2 = arith.constant 0 : index
    %c0_3 = arith.constant 0 : index
    %4 = vector.load %arg4[%c0_2, %c0_3] : memref<128x128xbf16, #tpu.memory_space<vmem>>, vector<128x128xbf16>
    %cst = arith.constant dense<0.000000e+00> : vector<256x128xf32>
    %5 = tpu.matmul %3, %4, %cst {dimension_numbers = #tpu.dot_dimension_numbers<[1], [0], [0], [1], [0, 0, 1, 1], [], []>} : vector<256x128xbf16>, vector<128x128xbf16>, vector<256x128xf32> -> vector<256x128xf32>
    %c0_4 = arith.constant 0 : index
    %c0_5 = arith.constant 0 : index
    %6 = vector.load %arg5[%c0_4, %c0_5] : memref<1x128xf32, #tpu.memory_space<vmem>>, vector<1x128xf32>
    %7 = vector.broadcast %6 : vector<1x128xf32> to vector<256x128xf32>
    %8 = arith.addf %5, %7 : vector<256x128xf32>
    %c0_6 = arith.constant 0 : index
    %c0_7 = arith.constant 0 : index
    %9 = vector.load %arg6[%c0_6, %c0_7] : memref<256x128xf32, #tpu.memory_space<vmem>>, vector<256x128xf32>
    tpu.vector_store %arg6[%c0_6, %c0_7], %8 {strides = array<i32>} : memref<256x128xf32, #tpu.memory_space<vmem>>, vector<256x128xf32>,
    return
  }
  func.func @transform_0(%arg0: i32, %arg1: i32) -> (i32, i32) {
    %c0_i32 = arith.constant 0 : i32
    %c0_i32_0 = arith.constant 0 : i32
    return %arg0, %c0_i32 : i32, i32
  }
  func.func @transform_1(%arg0: i32, %arg1: i32) -> (i32, i32) {
    %c0_i32 = arith.constant 0 : i32
    %c0_i32_0 = arith.constant 0 : i32
    %c0_i32_1 = arith.constant 0 : i32
    return %c0_i32, %c0_i32_0 : i32, i32
  }
  func.func @transform_2(%arg0: i32, %arg1: i32) -> (i32, i32) {
    %c0_i32 = arith.constant 0 : i32
    %c0_i32_0 = arith.constant 0 : i32
    return %c0_i32, %arg1 : i32, i32
  }
  func.func @transform_3(%arg0: i32, %arg1: i32) -> (i32, i32) {
    %c0_i32 = arith.constant 0 : i32
    %c0_i32_0 = arith.constant 0 : i32
    return %c0_i32, %arg1 : i32, i32
  }
  func.func @transform_4(%arg0: i32, %arg1: i32) -> (i32, i32) {
    %c0_i32 = arith.constant 0 : i32
    return %arg0, %arg1 : i32, i32
  }
}

</mosaic_0001>

<bundles_post_ra>
// kernel: tpu_custom_call.1
= control target key start
LH: loop header
LB: loop body
LE: loop exit
PB: predicated region body
PF: predicated region fallthrough
CT: control target
= control target key end

     0   :  { %s2906_s0 = inlined_call_operand.hbm [shape: bf16[512,256], index: 0, kind: input, shape index: {}]   ;;  %s2907_s1 = inlined_call_operand.hbm [shape: bf16[256,128], index: 1, kind: input, shape index: {}]   ;;  %s2908_s2 = inlined_call_operand.hbm [shape: bf16[128,384], index: 2, kind: input, shape index: {}]   ;;  %s2909_s3 = inlined_call_operand.vmem [shape: f32[1,384], index: 3, kind: input, shape index: {}]   ;;  %s2910_s4 = inlined_call_operand.hbm [shape: f32[512,384], index: 4, kind: output, shape index: {}]  }
   0x1   :  { %2923 = sst [smem:[#allocation26_spill]] %s2906_s0 }
   0x2   :  { %2924 = sst [smem:[#allocation27_spill]] %s2907_s1 }
   0x3   :  { %2925 = sst [smem:[#allocation28_spill]] %s2908_s2 }
   0x4   :  { %2926 = sst [smem:[#allocation29_spill]] %s2909_s3 }
   0x5   :  { %2927 = sst [smem:[#allocation30_spill]] %s2910_s4 }
   0x6   :  { %9 = vsyncpa [#allocation4], 0 }
   0x7   :  { %11 = vsyncpa [#allocation4 + $0x1], 0 }
   0x8   :  { %12 = vsyncpa [#allocation7], 0 }
   0x9   :  { %13 = vsyncpa [#allocation5], 0 }
   0xa   :  { %15 = vsyncpa [#allocation5 + $0x1], 0  ;;  %s2462_s15 = smov 0   ;;  %s2464_s16 = smov 0  }
   0xb   :  { %s2466_s17 = smov 0   ;;  %s2468_s18 = smov 0  }
   0xc   :  { %s2470_s19 = smov 0   ;;  %s2472_s20 = smov 0  }
   0xd   :  { %s2474_s21 = smov 0   ;;  %s2476_s22 = smov 0  }
   0xe   :  { %s2478_s23 = smov 0   ;;  %s2480_s24 = smov 0  }
   0xf   :  { %s2482_s25 = smov 0   ;;  %s2484_s26 = smov 0  }
  0x10   :  { %s2486_s27 = smov 0   ;;  %s2488_s28 = smov 0  }
  0x11 LB: > { %2928 = sst [smem:[#allocation14_spill]] %s2379_s17  ;;  %s30_s29 = sadd.s32 1, %s2415_s26  ;;  %s2423_s28 = sphi %s2488_s28, %s21_s28   ;;  %s2419_s27 = sphi %s2486_s27, %s2984_s27   ;;  %s2415_s26 = sphi %s2484_s26, %s2983_s26   ;;  %s2411_s25 = sphi %s2482_s25, %s2974_s25   ;;  %s2407_s24 = sphi %s2480_s24, %s2973_s24   ;;  %s2403_s23 = sphi %s2478_s23, %s2972_s23   ;;  %s2399_s22 = sphi %s2476_s22, %s2982_s22   ;;  %s2395_s21 = sphi %s2474_s21, %s2981_s21   ;;  %s2391_s20 = sphi %s2472_s20, %s2970_s20   ;;  %s2387_s19 = sphi %s2470_s19, %s2980_s19   ;;  %s2383_s18 = sphi %s2468_s18, %s2979_s18   ;;  %s2379_s17 = sphi %s2466_s17, %s2968_s17   ;;  %s2375_s16 = sphi %s2464_s16, %s2978_s16   ;;  %s2371_s15 = sphi %s2462_s15, %s2977_s15  }
  0x12   : > { %2929 = sst [smem:[#allocation15_spill]] %s2391_s20  ;;  %s33_s30 = sadd.s32 1, %s2419_s27 }
  0x13   : > { %2930 = sst [smem:[#allocation16_spill]] %s2403_s23  ;;  %p31_p0 = scmp.ge.s32.totalorder %s30_s29, 3 }
  0x14   : > { %2931 = sst [smem:[#allocation17_spill]] %s2407_s24  ;;  %s40_s5 = sadd.s32 1, %s2403_s23 }
  0x15   : > { %2932 = sst [smem:[#allocation18_spill]] %s2411_s25  ;;  %p47_p1 = scmp.ne.s32.totalorder %s2403_s23, %s2399_s22 }
  0x16   : > { %2933 = sst [smem:[#allocation19_spill]] %s2415_s26  ;;  %p48_p2 = scmp.eq.s32.totalorder %s2423_s28, 0 }
  0x17   : > { %2934 = sst [smem:[#allocation20_spill]] %s2419_s27  ;;  %s2986_s29 = smov (%p31_p0, %s30_s29), 0 }
  0x18   : > { %2935 = sst [smem:[#allocation21_spill]] %s2986_s29  ;;  %s2988_s30 = smov (!%p31_p0, %s33_s30), %s2419_s27 }
  0x19   : > { %p2543_p3 = por %p48_p2, %p47_p1  ;;  %s2549_s7 = ssub.s32 %s2415_s26, %s2986_s29 }
  0x1a   : > { %p35_p4 = scmp.ge.s32.totalorder %s2988_s30, 2  ;;  %p85_p5 = scmp.eq.s32.totalorder %s2549_s7, 0 }
  0x1b   : > { %s141_s8 = sadd.s32 1, %s2379_s17  ;;  %p1977_p6 = scmp.lt.s32.totalorder %s2423_s28, 6 }
  0x1c   : > { %s2990_s30 = smov (%p35_p4, %s2988_s30), 0  ;;  %s191_s9 = sand.u32 1, %s2423_s28  }
  0x1d   : > { %2937 = sst [smem:[#allocation22_spill]] %s2990_s30  ;;  %s37_s10 = ssub.s32 %s2419_s27, %s2990_s30 }
  0x1e   : > { %p38_p7 = scmp.eq.s32.totalorder %s37_s10, 0  ;;  %s138_s11 = sor.u32 %s2549_s7, %s37_s10 }
  0x1f   : > { %p139_p8 = scmp.eq.s32.totalorder %s138_s11, 0  ;;  %s193_s12 = sand.u32 1, %s2403_s23  }
  0x20   : > { %s2562_s13 = scalar_select %p38_p7, %s2403_s23, %s40_s5  }
  0x21   : > { %s2565_s14 = scalar_select %p139_p8, %s2379_s17, %s141_s8  }
  0x22   : > { %2938 = sst [smem:[#allocation23_spill]] %s2562_s13  ;;  %s1482_s29 = sshll.u32 %s193_s12, 8 }
  0x23   : > { %2939 = sst [smem:[#allocation24_spill]] %s2565_s14  ;;  %s1606_s4 = sshll.u32 %s2419_s27, 12 }
  0x24   : > { %s2940_s0 = sld [smem:[#allocation26_spill]]  ;;  %s195_s2 = scalar_lea.vmem [#allocation3], %s1482_s29 }
  0x25   : > { %s203_s1 = sshll.u32 %s195_s2, 4  ;;  %p2575_p9 = pnand %p1977_p6, %p2543_p3  ;;  %s204_s1 = int_to_ptr.vmem [resolvable:$true] %s203_s1 }
  0x26   : > { %s2579_s5 = scalar_lea.sflag [#allocation4], %s191_s9  ;;  %s2202_s8 = scalar_lea.vmem %s204_s1, 4096 }
  0x27   : > { %p2191_p10 = pneg %p2575_p9  ;;  %p2203_p11 = scmp.ne.s32.totalorder %s204_s1, %s2202_s8 }
  0x28   : > { %s2425_s3 = smov [#allocation3]  }
  0x29   : > { %p2205_p12 = pnand %p2203_p11, %p2191_p10 }
  0x2a   : > { %s202_s24 = scalar_lea.hbm %s2940_s0, %s1606_s4  ;;  %s2207_s4 = sshll.u32 %s2425_s3, 4  ;;  %s2208_s4 = int_to_ptr.vmem [resolvable:$false] %s2207_s4 }
  0x2b   : > { %p2206_p13 = pneg %p2205_p12  ;;  %s2209_s2 = scalar_lea.vmem %s2208_s4, 8192 }
  0x2c   : > { %p2210_p0 = scmp.lt.s32.totalorder %s204_s1, %s2208_s4  ;;  %p2211_p1 = scmp.lt.s32.totalorder %s2209_s2, %s2202_s8 }
  0x2e   : > { %p2212_p3 = por %p2211_p1, %p2210_p0 }
  0x30   : > { %p2213_p4 = pnand %p2212_p3, %p2206_p13 }
  0x32   : > { %2216 = shalt.err (!%p2213_p4)
}
  0x33   : > { %s2426_s25 = smov 128   ;;  %s2427_s29 = smov 8  }
  0x34   : > { %1968 = dma.hbm_to_vmem [thread:$0]  (!%p2575_p9), %s202_s24, 4096, %s204_s1, %s2579_s5, %s2426_s25, %s2426_s25, %s2427_s29  }
  0x35   : > { %s2587_s6 = sadd.s32 4294967295, %s2423_s28   ;;  %s1478_s9 = sadd.s32 4294967294, %s2423_s28  }
  0x36   : > { %p53_p7 = scmp.ne.s32.totalorder %s2399_s22, %s2395_s21  ;;  %p2915_p8 = scmp.eq.s32.totalorder %s2587_s6, 0 }
  0x37   : > { %s87_s10 = sadd.s32 1, %s2391_s20  ;;  %p94_p10 = scmp.ne.s32.totalorder %s2391_s20, %s2387_s19 }
  0x38   : > { %p2598_p11 = por %p2915_p8, %p53_p7  ;;  %p100_p12 = scmp.ne.s32.totalorder %s2387_s19, %s2383_s18 }
  0x39   : > { %s2607_s1 = scalar_select %p85_p5, %s2391_s20, %s87_s10  }
  0x3a   : > { %p2611_p9 = por %p94_p10, %p48_p2  ;;  %p2617_p13 = por %p100_p12, %p2915_p8 }
  0x3b   : > { %2943 = sst [smem:[#allocation25_spill]] %s2607_s1  ;;  %p151_p0 = scmp.ne.s32.totalorder %s2379_s17, %s2375_s16 }
  0x3c   : > { %s2945_s21 = scalar_select %p2617_p13, 1, 0 }
  0x3d   : > { %p152_p1 = scmp.eq.s32.totalorder %s2587_s6, 5  ;;  %p157_p3 = scmp.ne.s32.totalorder %s2375_s16, %s2371_s15 }
  0x3e   : > { %p158_p5 = scmp.eq.s32.totalorder %s1478_s9, 5  ;;  %p1479_p2 = scmp.ge.s32.totalorder %s2423_s28, 1 }
  0x3f   : > { %p2626_p4 = por %p152_p1, %p151_p0  ;;  %p165_p10 = scmp.lt.s32.totalorder %s2423_s28, 7 }
  0x40   : > { %p2631_p7 = por %p158_p5, %p157_p3  ;;  %s2428_s12 = smov [#allocation6]  }
  0x41   : > { %s2946_s18 = scalar_select %p2626_p4, 1, 0 }
  0x42   : > { %s2947_s30 = scalar_select %p2631_p7, 1, 0 }
  0x43   : > { %p2636_p12 = pnand %p1479_p2, %p165_p10  ;;  %s177_s8 = sshll.u32 %s2428_s12, 4  ;;  %s178_s8 = int_to_ptr.vmem [resolvable:$true] %s177_s8 }
  0x44   : > { %p2646_p0 = pnand %p1977_p6, %p2611_p9  ;;  %s215_s4 = sand.u32 1, %s2391_s20  }
  0x45   : > { %p1961_p8 = pneg %p2636_p12  ;;  %p2950_p1 = scmp.eq.s32.totalorder %s2587_s6, 0 }
  0x46   : > { %s1486_s25 = sshll.u32 %s215_s4, 6  ;;  %s1487_s29 = sshll.u32 %s2415_s26, 6 }
  0x47   : > { %p2653_p3 = pnand %p1961_p8, %p2950_p1  ;;  %s2228_s9 = scalar_lea.vmem %s178_s8, 2048 }
  0x48   : > { %p2229_p2 = scmp.ne.s32.totalorder %s178_s8, %s2228_s9  ;;  %p2236_p4 = scmp.lt.s32.totalorder %s178_s8, %s178_s8 }
  0x49   : > { %p2219_p5 = pneg %p2653_p3  ;;  %p2237_p6 = scmp.lt.s32.totalorder %s2228_s9, %s2228_s9 }
  0x4b   : > { %p2231_p10 = pnand %p2229_p2, %p2219_p5  ;;  %p2238_p9 = por %p2237_p6, %p2236_p4 }
  0x4d   : > { %p2232_p7 = pneg %p2231_p10 }
  0x4f   : > { %p2239_p13 = pnand %p2238_p9, %p2232_p7 }
  0x51   : > { %2242 = shalt.err (!%p2239_p13)
}
  0x52   : > { %s2429_s10 = smov 64   ;;  %s2430_s24 = smov 4  }
  0x53   : > { %s2952_s4 = sld [smem:[#allocation27_spill]]  ;;  %s217_s1 = scalar_lea.vmem [#allocation8], %s1486_s25 }
  0x54   : > { %s2953_s13 = sld [smem:[#allocation28_spill]]  ;;  %s223_s20 = sshll.u32 %s217_s1, 4  ;;  %s224_s20 = int_to_ptr.vmem [resolvable:$true] %s223_s20 }
  0x55   : > { %p2245_p8 = pneg %p2646_p0  ;;  %s2256_s9 = scalar_lea.vmem %s224_s20, 1024 }
  0x56   : > { %p2257_p13 = scmp.ne.s32.totalorder %s224_s20, %s2256_s9  ;;  %s2431_s14 = smov [#allocation8]  }
  0x57   : > { %s2261_s17 = sshll.u32 %s2431_s14, 4  ;;  %s2262_s17 = int_to_ptr.vmem [resolvable:$false] %s2261_s17 }
  0x58   : > { %p2259_p4 = pnand %p2257_p13, %p2245_p8  ;;  %s2263_s2 = scalar_lea.vmem %s2262_s17, 2048 }
  0x59   : > { %1964 = dma.hbm_to_vmem [thread:$0]  (!%p2653_p3), %s2952_s4, 2048, %s178_s8, [#allocation7], %s2429_s10, %s2429_s10, %s2430_s24  }
  0x5a   : > { %s222_s23 = scalar_lea.hbm %s2953_s13, %s1487_s29  ;;  %p2260_p7 = pneg %p2259_p4 }
  0x5b   : > { %p2264_p1 = scmp.lt.s32.totalorder %s224_s20, %s2262_s17  ;;  %p2265_p5 = scmp.lt.s32.totalorder %s2263_s2, %s2256_s9 }
  0x5d   : > { %p2266_p3 = por %p2265_p5, %p2264_p1 }
  0x5f   : > { %p2267_p2 = pnand %p2266_p3, %p2260_p7 }
  0x61   : > { %2270 = shalt.err (!%p2267_p2)
}
  0x62   : > { %s2432_s0 = smov 192   ;;  %241 = sbr.rel (%p2636_p12) target bundleno = 691 (0x2b3), region = 36 }
  0x63   : > { %1971 = dma.hbm_to_vmem [thread:$0]  (!%p2646_p0), %s222_s23, 1024, %s224_s20, %s2579_s5, %s2432_s0, %s2429_s10, %s2430_s24  }
  0x64   : > { %s243_s26 = sand.u32 (!%p2636_p12), 1, %s2587_s6   ;;  %s245_s27 = sand.u32 (!%p2636_p12), 1, %s2399_s22  }
  0x65   : > { %s1489_s13 = sshll.u32 (!%p2636_p12), %s245_s27, 8  ;;  %s244_s14 = scalar_lea.sflag (!%p2636_p12), [#allocation4], %s243_s26 }
  0x66   : > { %s2677_s17 = scalar_lea.vmem (!%p2636_p12), [#allocation3], %s1489_s13 }
  0x67   : > { %2354 = dma.done.wait (%p2598_p11), %s244_s14, 4096  }
  0x68   : > { %2356 = vsyncadd (%p2598_p11), %s244_s14, 4294963200  ;;  %p2954_p10 = scmp.eq.s32.totalorder %s2587_s6, 0 }
  0x6a   : > { %2358 = dma.done.wait (%p2954_p10), [#allocation7], 2048   ;;  %p2955_p0 = pmov %p2954_p10 }
  0x6b   : > { %s258_s20 = sand.u32 1, %s2387_s19   ;;  %p2956_p12 = scmp.ne.s32.totalorder %s2945_s21, 0 }
  0x6c   : > { %2360 = vsyncadd (%p2955_p0), [#allocation7], 4294965248  ;;  %s1491_s23 = sshll.u32 %s258_s20, 6 }
  0x6d   : > { %s2688_s5 = scalar_lea.vmem [#allocation8], %s1491_s23 }
  0x6e   : > { %2362 = dma.done.wait (%p2956_p12), %s244_s14, 1024  }
  0x6f   : > { %2364 = vsyncadd (%p2956_p12), %s244_s14, 4294966272  ;;  %s2957_s11 = sld [smem:[#allocation17_spill]]  ;;  %s290_s1 = sand.u32 1, %s2375_s16  }
  0x70   : > { %s1492_s6 = sshll.u32 %s290_s1, 8  ;;  %s2958_s25 = sld [smem:[#allocation29_spill]] }
  0x71   : > { %s2705_s10 = scalar_lea.vmem [#allocation9], %s1492_s6 }
  0x75   : > { %p294_p11 = scmp.lt.s32.totalorder %s2957_s11, 2  ;;  %p1493_p6 = scmp.ne.s32.totalorder %s2957_s11, 0 }
  0x77   : > { %s2699_s7 = scalar_select %p294_p11, %s2957_s11, 2 }
  0x78   : > { %302 = sbr.rel (%p1493_p6) target bundleno = 418 (0x1a2), region = 52 }
  0x79   : > { %s296_s29 = scalar_lea.vmem %s2958_s25, %s2699_s7 }
  0x7d   : > { %v2101_v0 = vld [vmem:[#allocation6 + $0x78] sm:$0xff]   ;;  %v2103_v2 = vld [vmem:[#allocation6 + $0x70] sm:$0xff]   ;;  %v2105_v4 = vld [vmem:[#allocation6 + $0x68] sm:$0xff]  }
  0x7e   : > { %v2102_v1 = vld [vmem:[#allocation6 + $0x38] sm:$0xff]   ;;  %1734 = vmatprep.subr.bf16.mxu0 %v2101_v0  ;;  %1918 = vmatprep.subr.bf16.mxu1 %v2101_v0  ;;  %v2104_v3 = vld [vmem:[#allocation6 + $0x30] sm:$0xff]   ;;  %v2106_v5 = vld [vmem:[#allocation6 + $0x28] sm:$0xff]  }
  0x7f   : > { %1735 = vmatpush3.bf16.msra.mxu0 %v2102_v1  ;;  %1926 = vmatpush3.bf16.msra.mxu1 %v2102_v1  ;;  %v2107_v6 = vld [vmem:[#allocation6 + $0x60] sm:$0xff]   ;;  %v2109_v8 = vld [vmem:[#allocation6 + $0x58] sm:$0xff]   ;;  %v2111_v10 = vld [vmem:[#allocation6 + $0x50] sm:$0xff]  }
  0x80   : > { %1736 = vmatprep.subr.bf16.mxu0 %v2103_v2  ;;  %1919 = vmatprep.subr.bf16.mxu1 %v2103_v2  ;;  %v2108_v7 = vld [vmem:[#allocation6 + $0x20] sm:$0xff]   ;;  %v2110_v9 = vld [vmem:[#allocation6 + $0x18] sm:$0xff]   ;;  %v2112_v13 = vld [vmem:[#allocation6 + $0x10] sm:$0xff]  }
  0x81   : > { %v2119_v11 = vld [vmem:[%s2677_s17 + $0x4] ss:$8 sps:$4 sm:$0xff]   ;;  %v2117_v18 = vld [vmem:[%s2677_s17] ss:$8 sps:$4 sm:$0xff]   ;;  %v2123_v20 = vld [vmem:[%s2677_s17 + $0x14] ss:$8 sps:$4 sm:$0xff]  }
  0x82   : > { %v2122_v12 = vld [vmem:[%s2677_s17 + $0x84] ss:$8 sps:$4 sm:$0xff]   ;;  %655 = vmatprep.mubr.bf16.mxu0 %v2119_v11  ;;  %v2120_v19 = vld [vmem:[%s2677_s17 + $0x80] ss:$8 sps:$4 sm:$0xff]   ;;  %v2125_v21 = vld [vmem:[%s2677_s17 + $0x94] ss:$8 sps:$4 sm:$0xff]  }
  0x83   : > { %1737 = vmatpush3.bf16.msra.mxu0 %v2104_v3  ;;  %1927 = vmatpush3.bf16.msra.mxu1 %v2104_v3  ;;  %v2113_v14 = vld [vmem:[#allocation6 + $0x48] sm:$0xff]   ;;  %v2115_v16 = vld [vmem:[#allocation6 + $0x40] sm:$0xff]   ;;  %v2127_v22 = vld [vmem:[%s2677_s17 + $0x10] ss:$8 sps:$4 sm:$0xff]  }
  0x84   : > { %1738 = vmatprep.subr.bf16.mxu0 %v2105_v4  ;;  %1920 = vmatprep.subr.bf16.mxu1 %v2105_v4  ;;  %v2114_v15 = vld [vmem:[#allocation6 + $0x8] sm:$0xff]   ;;  %v2116_v17 = vld [vmem:[#allocation6] sm:$0xff]   ;;  %v2128_v23 = vld [vmem:[%s2677_s17 + $0x90] ss:$8 sps:$4 sm:$0xff]  }
  0x85   : > { %719 = vmatprep.mubr.bf16.mxu1 %v2122_v12  ;;  %v2129_v24 = vld [vmem:[%s2677_s17 + $0x24] ss:$8 sps:$4 sm:$0xff]   ;;  %v2133_v26 = vld [vmem:[%s2677_s17 + $0x20] ss:$8 sps:$4 sm:$0xff]   ;;  %v2135_v28 = vld [vmem:[%s2677_s17 + $0x34] ss:$8 sps:$4 sm:$0xff]  }
  0x86   : > { %v2131_v25 = vld [vmem:[%s2677_s17 + $0xa4] ss:$8 sps:$4 sm:$0xff]   ;;  %v2134_v27 = vld [vmem:[%s2677_s17 + $0xa0] ss:$8 sps:$4 sm:$0xff]   ;;  %v2137_v29 = vld [vmem:[%s2677_s17 + $0xb4] ss:$8 sps:$4 sm:$0xff]  }
  0x87   : > { %1739 = vmatpush3.bf16.msra.mxu0 %v2106_v5  ;;  %1928 = vmatpush3.bf16.msra.mxu1 %v2106_v5  ;;  %v2139_v30 = vld [vmem:[%s2677_s17 + $0x30] ss:$8 sps:$4 sm:$0xff]   ;;  %v2141_v32 = vld [vmem:[%s2677_s17 + $0x44] ss:$8 sps:$4 sm:$0xff]   ;;  %v2145_v34 = vld [vmem:[%s2677_s17 + $0x40] ss:$8 sps:$4 sm:$0xff]  }
  0x88   : > { %1740 = vmatprep.subr.bf16.mxu0 %v2107_v6  ;;  %1921 = vmatprep.subr.bf16.mxu1 %v2107_v6  ;;  %v2140_v31 = vld [vmem:[%s2677_s17 + $0xb0] ss:$8 sps:$4 sm:$0xff]   ;;  %v2143_v33 = vld [vmem:[%s2677_s17 + $0xc4] ss:$8 sps:$4 sm:$0xff]   ;;  %v2146_v35 = vld [vmem:[%s2677_s17 + $0xc0] ss:$8 sps:$4 sm:$0xff]  }
  0x89   : > { %v2147_v36 = vld [vmem:[%s2677_s17 + $0x54] ss:$8 sps:$4 sm:$0xff]   ;;  %v2151_v38 = vld [vmem:[%s2677_s17 + $0x50] ss:$8 sps:$4 sm:$0xff]   ;;  %v2153_v40 = vld [vmem:[%s2677_s17 + $0x64] ss:$8 sps:$4 sm:$0xff]  }
  0x8a   : > { %v2149_v37 = vld [vmem:[%s2677_s17 + $0xd4] ss:$8 sps:$4 sm:$0xff]   ;;  %v2152_v39 = vld [vmem:[%s2677_s17 + $0xd0] ss:$8 sps:$4 sm:$0xff]   ;;  %v2155_v41 = vld [vmem:[%s2677_s17 + $0xe4] ss:$8 sps:$4 sm:$0xff]  }
  0x8b   : > { %1741 = vmatpush3.bf16.msra.mxu0 %v2108_v7  ;;  %1929 = vmatpush3.bf16.msra.mxu1 %v2108_v7  ;;  %v2157_v42 = vld [vmem:[%s2677_s17 + $0x60] ss:$8 sps:$4 sm:$0xff]   ;;  %v2159_v44 = vld [vmem:[%s2677_s17 + $0x74] ss:$8 sps:$4 sm:$0xff]   ;;  %v2163_v46 = vld [vmem:[%s2677_s17 + $0x70] ss:$8 sps:$4 sm:$0xff]  }
  0x8c   : > { %1742 = vmatprep.subr.bf16.mxu0 %v2109_v8  ;;  %1922 = vmatprep.subr.bf16.mxu1 %v2109_v8  ;;  %v2158_v43 = vld [vmem:[%s2677_s17 + $0xe0] ss:$8 sps:$4 sm:$0xff]   ;;  %v2161_v45 = vld [vmem:[%s2677_s17 + $0xf4] ss:$8 sps:$4 sm:$0xff]   ;;  %v2164_v47 = vld [vmem:[%s2677_s17 + $0xf0] ss:$8 sps:$4 sm:$0xff]  }
  0x8f   : > { %1743 = vmatpush3.bf16.msra.mxu0 %v2110_v9  ;;  %1930 = vmatpush3.bf16.msra.mxu1 %v2110_v9 }
  0x90   : > { %1744 = vmatprep.subr.bf16.mxu0 %v2111_v10  ;;  %1923 = vmatprep.subr.bf16.mxu1 %v2111_v10 }
  0x93   : > { %1745 = vmatpush3.bf16.msra.mxu0 %v2112_v13  ;;  %1931 = vmatpush3.bf16.msra.mxu1 %v2112_v13 }
  0x94   : > { %1746 = vmatprep.subr.bf16.mxu0 %v2113_v14  ;;  %1924 = vmatprep.subr.bf16.mxu1 %v2113_v14 }
  0x97   : > { %1747 = vmatpush3.bf16.msra.mxu0 %v2114_v15  ;;  %1932 = vmatpush3.bf16.msra.mxu1 %v2114_v15 }
  0x98   : > { %1748 = vmatprep.subr.bf16.mxu0 %v2115_v16  ;;  %1925 = vmatprep.subr.bf16.mxu1 %v2115_v16 }
  0x9b   : > { %1749 = vmatpush3.bf16.msra.mxu0 %v2116_v17  ;;  %1933 = vmatpush3.bf16.msra.mxu1 %v2116_v17 }
  0x9e   : > { %656 = vmatmul.mubr.bf16.vlgmr.msra.gmra.mxu0 %v2117_v18  ;;  %720 = vmatmul.mubr.bf16.vlgmr.msra.gmra.mxu1 %v2120_v19 }
  0x9f   : > { %663 = vmatprep.mubr.bf16.mxu0 %v2123_v20  ;;  %727 = vmatprep.mubr.bf16.mxu1 %v2125_v21 }
  0xa6   : > { %664 = vmatmul.mubr.bf16.gmra.mxu0 %v2127_v22  ;;  %728 = vmatmul.mubr.bf16.gmra.mxu1 %v2128_v23 }
  0xa7   : > { %671 = vmatprep.mubr.bf16.mxu0 %v2129_v24  ;;  %735 = vmatprep.mubr.bf16.mxu1 %v2131_v25 }
  0xae   : > { %672 = vmatmul.mubr.bf16.gmra.mxu0 %v2133_v26  ;;  %736 = vmatmul.mubr.bf16.gmra.mxu1 %v2134_v27 }
  0xaf   : > { %679 = vmatprep.mubr.bf16.mxu0 %v2135_v28  ;;  %743 = vmatprep.mubr.bf16.mxu1 %v2137_v29 }
  0xb6   : > { %680 = vmatmul.mubr.bf16.gmra.mxu0 %v2139_v30  ;;  %744 = vmatmul.mubr.bf16.gmra.mxu1 %v2140_v31 }
  0xb7   : > { %687 = vmatprep.mubr.bf16.mxu0 %v2141_v32  ;;  %751 = vmatprep.mubr.bf16.mxu1 %v2143_v33 }
  0xbe   : > { %688 = vmatmul.mubr.bf16.gmra.mxu0 %v2145_v34  ;;  %752 = vmatmul.mubr.bf16.gmra.mxu1 %v2146_v35 }
  0xbf   : > { %695 = vmatprep.mubr.bf16.mxu0 %v2147_v36  ;;  %759 = vmatprep.mubr.bf16.mxu1 %v2149_v37 }
  0xc6   : > { %696 = vmatmul.mubr.bf16.gmra.mxu0 %v2151_v38  ;;  %760 = vmatmul.mubr.bf16.gmra.mxu1 %v2152_v39 }
  0xc7   : > { %703 = vmatprep.mubr.bf16.mxu0 %v2153_v40  ;;  %767 = vmatprep.mubr.bf16.mxu1 %v2155_v41 }
  0xce   : > { %704 = vmatmul.mubr.bf16.gmra.mxu0 %v2157_v42  ;;  %768 = vmatmul.mubr.bf16.gmra.mxu1 %v2158_v43 }
  0xcf   : > { %711 = vmatprep.mubr.bf16.mxu0 %v2159_v44  ;;  %775 = vmatprep.mubr.bf16.mxu1 %v2161_v45 }
  0xd6   : > { %712 = vmatmul.mubr.bf16.gmra.mxu0 %v2163_v46  ;;  %776 = vmatmul.mubr.bf16.gmra.mxu1 %v2164_v47 }
 0x15e   : > { %v1750_v48 = vpop.f32.mrf.mxu0  ;;  %v1798_v49 = vpop.f32.mrf.mxu1 }
 0x160   : > { %v1751_v50 = vpop.f32.mrf.mxu0  ;;  %v1799_v51 = vpop.f32.mrf.mxu1 }
 0x161   : > { %v1752_v56 = vadd.f32 %v1751_v50, %v1750_v48  ;;  %v1800_v57 = vadd.f32 %v1799_v51, %v1798_v49 }
 0x162   : > { %v1753_v52 = vpop.f32.mrf.mxu0  ;;  %v1801_v53 = vpop.f32.mrf.mxu1 }
 0x164   : > { %v1754_v54 = vpop.f32.mrf.mxu0  ;;  %v1802_v55 = vpop.f32.mrf.mxu1 }
 0x165   : > { %v1755_v58 = vadd.f32 %v1754_v54, %v1753_v52  ;;  %v1803_v59 = vadd.f32 %v1802_v55, %v1801_v53 }
 0x166   : > { %v1756_v60 = vpop.f32.mrf.mxu0  ;;  %v1804_v61 = vpop.f32.mrf.mxu1 }
 0x167   : > { %v1642_v62 = vpack.c.bf16 %v1755_v58, %v1752_v56  ;;  %v1682_v63 = vpack.c.bf16 %v1803_v59, %v1800_v57 }
 0x168   : > { %v1757_v0 = vpop.f32.mrf.mxu0  ;;  %v1805_v1 = vpop.f32.mrf.mxu1 }
 0x169   : > { %1643 = vst [vmem:[#allocation2] sm:$0xff] %v1642_v62   ;;  %1726 = vst [vmem:[#allocation2 + $0x40] sm:$0xff] %v1682_v63   ;;  %v1758_v6 = vadd.f32 %v1757_v0, %v1756_v60  ;;  %v1806_v7 = vadd.f32 %v1805_v1, %v1804_v61 }
 0x16a   : > { %v1759_v2 = vpop.f32.mrf.mxu0  ;;  %v1807_v3 = vpop.f32.mrf.mxu1 }
 0x16c   : > { %v1760_v4 = vpop.f32.mrf.mxu0  ;;  %v1808_v5 = vpop.f32.mrf.mxu1 }
 0x16d   : > { %v1761_v8 = vadd.f32 %v1760_v4, %v1759_v2  ;;  %v1809_v9 = vadd.f32 %v1808_v5, %v1807_v3 }
 0x16e   : > { %v1762_v10 = vpop.f32.mrf.mxu0  ;;  %v1810_v11 = vpop.f32.mrf.mxu1 }
 0x16f   : > { %v1647_v12 = vpack.c.bf16 %v1761_v8, %v1758_v6  ;;  %v1687_v13 = vpack.c.bf16 %v1809_v9, %v1806_v7 }
 0x170   : > { %v1763_v14 = vpop.f32.mrf.mxu0  ;;  %v1811_v15 = vpop.f32.mrf.mxu1 }
 0x171   : > { %1719 = vst [vmem:[#allocation2 + $0x8] sm:$0xff] %v1647_v12   ;;  %1727 = vst [vmem:[#allocation2 + $0x48] sm:$0xff] %v1687_v13   ;;  %v1764_v20 = vadd.f32 %v1763_v14, %v1762_v10  ;;  %v1812_v21 = vadd.f32 %v1811_v15, %v1810_v11 }
 0x172   : > { %v1765_v16 = vpop.f32.mrf.mxu0  ;;  %v1813_v17 = vpop.f32.mrf.mxu1 }
 0x174   : > { %v1766_v18 = vpop.f32.mrf.mxu0  ;;  %v1814_v19 = vpop.f32.mrf.mxu1 }
 0x175   : > { %v1767_v22 = vadd.f32 %v1766_v18, %v1765_v16  ;;  %v1815_v23 = vadd.f32 %v1814_v19, %v1813_v17 }
 0x176   : > { %v1768_v24 = vpop.f32.mrf.mxu0  ;;  %v1816_v25 = vpop.f32.mrf.mxu1 }
 0x177   : > { %v1652_v26 = vpack.c.bf16 %v1767_v22, %v1764_v20  ;;  %v1692_v27 = vpack.c.bf16 %v1815_v23, %v1812_v21 }
 0x178   : > { %v1769_v28 = vpop.f32.mrf.mxu0  ;;  %v1817_v29 = vpop.f32.mrf.mxu1 }
 0x179   : > { %1720 = vst [vmem:[#allocation2 + $0x10] sm:$0xff] %v1652_v26   ;;  %1728 = vst [vmem:[#allocation2 + $0x50] sm:$0xff] %v1692_v27   ;;  %v1770_v34 = vadd.f32 %v1769_v28, %v1768_v24  ;;  %v1818_v35 = vadd.f32 %v1817_v29, %v1816_v25 }
 0x17a   : > { %v1771_v30 = vpop.f32.mrf.mxu0  ;;  %v1819_v31 = vpop.f32.mrf.mxu1 }
 0x17c   : > { %v1772_v32 = vpop.f32.mrf.mxu0  ;;  %v1820_v33 = vpop.f32.mrf.mxu1 }
 0x17d   : > { %v1773_v36 = vadd.f32 %v1772_v32, %v1771_v30  ;;  %v1821_v37 = vadd.f32 %v1820_v33, %v1819_v31 }
 0x17e   : > { %v1774_v38 = vpop.f32.mrf.mxu0  ;;  %v1822_v39 = vpop.f32.mrf.mxu1 }
 0x17f   : > { %v1657_v40 = vpack.c.bf16 %v1773_v36, %v1770_v34  ;;  %v1697_v41 = vpack.c.bf16 %v1821_v37, %v1818_v35 }
 0x180   : > { %v1775_v42 = vpop.f32.mrf.mxu0  ;;  %v1823_v43 = vpop.f32.mrf.mxu1 }
 0x181   : > { %1721 = vst [vmem:[#allocation2 + $0x18] sm:$0xff] %v1657_v40   ;;  %1729 = vst [vmem:[#allocation2 + $0x58] sm:$0xff] %v1697_v41   ;;  %v1776_v48 = vadd.f32 %v1775_v42, %v1774_v38  ;;  %v1824_v49 = vadd.f32 %v1823_v43, %v1822_v39 }
 0x182   : > { %v1777_v44 = vpop.f32.mrf.mxu0  ;;  %v1825_v45 = vpop.f32.mrf.mxu1 }
 0x184   : > { %v1778_v46 = vpop.f32.mrf.mxu0  ;;  %v1826_v47 = vpop.f32.mrf.mxu1 }
 0x185   : > { %v1779_v50 = vadd.f32 %v1778_v46, %v1777_v44  ;;  %v1827_v51 = vadd.f32 %v1826_v47, %v1825_v45 }
 0x186   : > { %v1780_v52 = vpop.f32.mrf.mxu0  ;;  %v1828_v53 = vpop.f32.mrf.mxu1 }
 0x187   : > { %v1662_v54 = vpack.c.bf16 %v1779_v50, %v1776_v48  ;;  %v1702_v55 = vpack.c.bf16 %v1827_v51, %v1824_v49 }
 0x188   : > { %v1781_v56 = vpop.f32.mrf.mxu0  ;;  %v1829_v57 = vpop.f32.mrf.mxu1 }
 0x189   : > { %1722 = vst [vmem:[#allocation2 + $0x20] sm:$0xff] %v1662_v54   ;;  %1730 = vst [vmem:[#allocation2 + $0x60] sm:$0xff] %v1702_v55   ;;  %v1782_v62 = vadd.f32 %v1781_v56, %v1780_v52  ;;  %v1830_v63 = vadd.f32 %v1829_v57, %v1828_v53 }
 0x18a   : > { %v1783_v58 = vpop.f32.mrf.mxu0  ;;  %v1831_v59 = vpop.f32.mrf.mxu1 }
 0x18c   : > { %v1784_v60 = vpop.f32.mrf.mxu0  ;;  %v1832_v61 = vpop.f32.mrf.mxu1 }
 0x18d   : > { %v1785_v0 = vadd.f32 %v1784_v60, %v1783_v58  ;;  %v1833_v1 = vadd.f32 %v1832_v61, %v1831_v59 }
 0x18e   : > { %v1786_v2 = vpop.f32.mrf.mxu0  ;;  %v1834_v3 = vpop.f32.mrf.mxu1 }
 0x18f   : > { %v1667_v4 = vpack.c.bf16 %v1785_v0, %v1782_v62  ;;  %v1707_v5 = vpack.c.bf16 %v1833_v1, %v1830_v63 }
 0x190   : > { %v1787_v6 = vpop.f32.mrf.mxu0  ;;  %v1835_v7 = vpop.f32.mrf.mxu1 }
 0x191   : > { %1723 = vst [vmem:[#allocation2 + $0x28] sm:$0xff] %v1667_v4   ;;  %1731 = vst [vmem:[#allocation2 + $0x68] sm:$0xff] %v1707_v5   ;;  %v1788_v12 = vadd.f32 %v1787_v6, %v1786_v2  ;;  %v1836_v13 = vadd.f32 %v1835_v7, %v1834_v3 }
 0x192   : > { %v1789_v8 = vpop.f32.mrf.mxu0  ;;  %v1837_v9 = vpop.f32.mrf.mxu1 }
 0x194   : > { %v1790_v10 = vpop.f32.mrf.mxu0  ;;  %v1838_v11 = vpop.f32.mrf.mxu1 }
 0x195   : > { %v1791_v14 = vadd.f32 %v1790_v10, %v1789_v8  ;;  %v1839_v15 = vadd.f32 %v1838_v11, %v1837_v9 }
 0x196   : > { %v1792_v16 = vpop.f32.mrf.mxu0  ;;  %v1840_v17 = vpop.f32.mrf.mxu1 }
 0x197   : > { %v1672_v18 = vpack.c.bf16 %v1791_v14, %v1788_v12  ;;  %v1712_v19 = vpack.c.bf16 %v1839_v15, %v1836_v13 }
 0x198   : > { %v1793_v20 = vpop.f32.mrf.mxu0  ;;  %v1841_v21 = vpop.f32.mrf.mxu1 }
 0x199   : > { %1724 = vst [vmem:[#allocation2 + $0x30] sm:$0xff] %v1672_v18   ;;  %1732 = vst [vmem:[#allocation2 + $0x70] sm:$0xff] %v1712_v19   ;;  %v1794_v26 = vadd.f32 %v1793_v20, %v1792_v16  ;;  %v1842_v27 = vadd.f32 %v1841_v21, %v1840_v17 }
 0x19a   : > { %v1795_v22 = vpop.f32.mrf.mxu0  ;;  %v1843_v23 = vpop.f32.mrf.mxu1 }
 0x19c   : > { %v1796_v24 = vpop.f32.mrf.mxu0  ;;  %v1844_v25 = vpop.f32.mrf.mxu1 }
 0x19d   : > { %v1797_v28 = vadd.f32 %v1796_v24, %v1795_v22  ;;  %v1845_v29 = vadd.f32 %v1844_v25, %v1843_v23 }
 0x19f   : > { %v1677_v30 = vpack.c.bf16 %v1797_v28, %v1794_v26  ;;  %v1717_v31 = vpack.c.bf16 %v1845_v29, %v1842_v27 }
 0x1a1   : > { %1725 = vst [vmem:[#allocation2 + $0x38] sm:$0xff] %v1677_v30   ;;  %1733 = vst [vmem:[#allocation2 + $0x78] sm:$0xff] %v1717_v31  }
 0x1a2 PF: > { %v2165_v32 = vld [vmem:[%s2688_s5 + $0x38] sm:$0xff]   ;;  %v2166_v33 = vld [vmem:[%s2688_s5 + $0x30] sm:$0xff]   ;;  %v2167_v34 = vld [vmem:[%s2688_s5 + $0x28] sm:$0xff]   ;;  %s2960_s4 = sld [smem:[#allocation18_spill]]  ;;  %s1352_s27 = sshll.u32 %s2705_s10, 4  ;;  %s2821_s27 = int_to_ptr.vmem [resolvable:$true] %s1352_s27 }
 0x1a3   : > { %1870 = vmatprep.subr.bf16.mxu0 %v2165_v32  ;;  %1934 = vmatprep.subr.bf16.mxu1 %v2165_v32  ;;  %v2168_v35 = vld [vmem:[%s2688_s5 + $0x20] sm:$0xff]   ;;  %v2169_v38 = vld [vmem:[%s2688_s5 + $0x18] sm:$0xff]   ;;  %v2170_v39 = vld [vmem:[%s2688_s5 + $0x10] sm:$0xff]   ;;  %s2961_s9 = sld [smem:[#allocation17_spill]]  ;;  %s2831_s23 = scalar_lea.sflag [#allocation5], %s290_s1 }
 0x1a4   : > { %1871 = vmatpush3.bf16.msra.mxu0 %v2165_v32  ;;  %1942 = vmatpush3.bf16.msra.mxu1 %v2165_v32  ;;  %v2173_v36 = vld [vmem:[#allocation2] sm:$0xff]   ;;  %v2171_v40 = vld [vmem:[%s2688_s5 + $0x8] sm:$0xff]   ;;  %v2177_v44 = vld [vmem:[#allocation2 + $0x10] sm:$0xff]   ;;  %s2962_s17 = sld [smem:[#allocation30_spill]]  ;;  %s2271_s11 = scalar_lea.vmem %s2821_s27, 4096 }
 0x1a5   : > { %1872 = vmatprep.subr.bf16.mxu0 %v2166_v33  ;;  %1935 = vmatprep.subr.bf16.mxu1 %v2166_v33  ;;  %v2174_v37 = vld [vmem:[#allocation2 + $0x40] sm:$0xff]   ;;  %v2175_v42 = vld [vmem:[#allocation2 + $0x8] sm:$0xff]   ;;  %v2178_v45 = vld [vmem:[#allocation2 + $0x50] sm:$0xff]   ;;  %p2272_p9 = scmp.ne.s32.totalorder %s2821_s27, %s2271_s11  ;;  %p2964_p8 = scmp.ne.s32.totalorder %s2946_s18, 0 }
 0x1a6   : > { %1886 = vmatprep.mubr.bf16.mxu0 %v2173_v36  ;;  %1902 = vmatprep.mubr.bf16.mxu1 %v2174_v37  ;;  %v2172_v41 = vld [vmem:[%s2688_s5] sm:$0xff]   ;;  %v2176_v43 = vld [vmem:[#allocation2 + $0x48] sm:$0xff]   ;;  %v2179_v46 = vld [vmem:[#allocation2 + $0x18] sm:$0xff]   ;;  %s2433_s6 = smov [#allocation9]  }
 0x1a7   : > { %v2180_v47 = vld [vmem:[#allocation2 + $0x58] sm:$0xff]   ;;  %v2181_v48 = vld [vmem:[#allocation2 + $0x20] sm:$0xff]   ;;  %v2183_v50 = vld [vmem:[#allocation2 + $0x28] sm:$0xff]   ;;  %p2273_p13 = pnand %p2272_p9, %p2964_p8  ;;  %s2275_s7 = sshll.u32 %s2433_s6, 4  ;;  %s2276_s7 = int_to_ptr.vmem [resolvable:$false] %s2275_s7 }
 0x1a8   : > { %1873 = vmatpush3.bf16.msra.mxu0 %v2166_v33  ;;  %1943 = vmatpush3.bf16.msra.mxu1 %v2166_v33  ;;  %v2182_v49 = vld [vmem:[#allocation2 + $0x60] sm:$0xff]   ;;  %v2184_v51 = vld [vmem:[#allocation2 + $0x68] sm:$0xff]   ;;  %v2185_v52 = vld [vmem:[#allocation2 + $0x30] sm:$0xff]   ;;  %s1950_s2 = smul.u32 96, %s2960_s4  ;;  %s2277_s8 = scalar_lea.vmem %s2276_s7, 8192 }
 0x1a9   : > { %1874 = vmatprep.subr.bf16.mxu0 %v2167_v34  ;;  %1936 = vmatprep.subr.bf16.mxu1 %v2167_v34  ;;  %v2186_v53 = vld [vmem:[#allocation2 + $0x70] sm:$0xff]   ;;  %v2187_v54 = vld [vmem:[#allocation2 + $0x38] sm:$0xff]   ;;  %v2753_v56 = vld [vmem:[%s296_s29] ss:$0 sm:$0xff]  ;;  %p2274_p4 = pneg %p2273_p13  ;;  %p2278_p7 = scmp.lt.s32.totalorder %s2821_s27, %s2276_s7 }
 0x1aa   : > { %v2188_v55 = vld [vmem:[#allocation2 + $0x78] sm:$0xff]   ;;  %s1349_s0 = sadd.s32 %s2961_s9, %s1950_s2  ;;  %s2963_s5 = smov %s2962_s17 }
 0x1ab   : > { %s1602_s26 = sshll.u32 %s1349_s0, 7  ;;  %p2279_p1 = scmp.lt.s32.totalorder %s2277_s8, %s2271_s11 }
 0x1ac   : > { %1875 = vmatpush3.bf16.msra.mxu0 %v2167_v34  ;;  %1944 = vmatpush3.bf16.msra.mxu1 %v2167_v34  ;;  %s2819_s20 = scalar_lea.hbm %s2962_s17, %s1602_s26 }
 0x1ad   : > { %1876 = vmatprep.subr.bf16.mxu0 %v2168_v35  ;;  %1937 = vmatprep.subr.bf16.mxu1 %v2168_v35  ;;  %p2280_p5 = por %p2279_p1, %p2278_p7 }
 0x1af   : > { %p2281_p3 = pnand %p2280_p5, %p2274_p4 }
 0x1b0   : > { %1877 = vmatpush3.bf16.msra.mxu0 %v2168_v35  ;;  %1945 = vmatpush3.bf16.msra.mxu1 %v2168_v35 }
 0x1b1   : > { %1878 = vmatprep.subr.bf16.mxu0 %v2169_v38  ;;  %1938 = vmatprep.subr.bf16.mxu1 %v2169_v38 }
 0x1b4   : > { %1879 = vmatpush3.bf16.msra.mxu0 %v2169_v38  ;;  %1946 = vmatpush3.bf16.msra.mxu1 %v2169_v38 }
 0x1b5   : > { %1880 = vmatprep.subr.bf16.mxu0 %v2170_v39  ;;  %1939 = vmatprep.subr.bf16.mxu1 %v2170_v39 }
 0x1b8   : > { %1881 = vmatpush3.bf16.msra.mxu0 %v2170_v39  ;;  %1947 = vmatpush3.bf16.msra.mxu1 %v2170_v39 }
 0x1b9   : > { %1882 = vmatprep.subr.bf16.mxu0 %v2171_v40  ;;  %1940 = vmatprep.subr.bf16.mxu1 %v2171_v40 }
 0x1bc   : > { %1883 = vmatpush3.bf16.msra.mxu0 %v2171_v40  ;;  %1948 = vmatpush3.bf16.msra.mxu1 %v2171_v40 }
 0x1bd   : > { %1884 = vmatprep.subr.bf16.mxu0 %v2172_v41  ;;  %1941 = vmatprep.subr.bf16.mxu1 %v2172_v41 }
 0x1c0   : > { %1885 = vmatpush3.bf16.msra.mxu0 %v2172_v41  ;;  %1949 = vmatpush3.bf16.msra.mxu1 %v2172_v41 }
 0x1c3   : > { %1887 = vmatmul.mubr.bf16.vlgmr.msra.gmra.mxu0 %v2175_v42  ;;  %1903 = vmatmul.mubr.bf16.vlgmr.msra.gmra.mxu1 %v2176_v43 }
 0x1c4   : > { %1890 = vmatprep.mubr.bf16.mxu0 %v2177_v44  ;;  %1906 = vmatprep.mubr.bf16.mxu1 %v2178_v45 }
 0x1cb   : > { %1891 = vmatmul.mubr.bf16.gmra.mxu0 %v2179_v46  ;;  %1907 = vmatmul.mubr.bf16.gmra.mxu1 %v2180_v47 }
 0x1cc   : > { %1894 = vmatprep.mubr.bf16.mxu0 %v2181_v48  ;;  %1910 = vmatprep.mubr.bf16.mxu1 %v2182_v49 }
 0x1d3   : > { %1895 = vmatmul.mubr.bf16.gmra.mxu0 %v2183_v50  ;;  %1911 = vmatmul.mubr.bf16.gmra.mxu1 %v2184_v51 }
 0x1d4   : > { %1898 = vmatprep.mubr.bf16.mxu0 %v2185_v52  ;;  %1914 = vmatprep.mubr.bf16.mxu1 %v2186_v53 }
 0x1db   : > { %1899 = vmatmul.mubr.bf16.gmra.mxu0 %v2187_v54  ;;  %1915 = vmatmul.mubr.bf16.gmra.mxu1 %v2188_v55 }
 0x283   : > { %v1888_v57 = vpop.f32.mrf.mxu0  ;;  %v1904_v58 = vpop.f32.mrf.mxu1 }
 0x284   : > { %v1186_v59 = vadd.f32 %v1888_v57, %v2753_v56  ;;  %v1250_v60 = vadd.f32 %v1904_v58, %v2753_v56 }
 0x285   : > { %v1177_v61 = vpop.f32.mrf.mxu0  ;;  %v1241_v62 = vpop.f32.mrf.mxu1 }
 0x286   : > { %1306 = vst [vmem:[%s2705_s10 + $0x10] sm:$0xff] %v1186_v59  ;;  %1322 = vst [vmem:[%s2705_s10 + $0x90] sm:$0xff] %v1250_v60  ;;  %v1178_v63 = vadd.f32 %v2753_v56, %v1177_v61  ;;  %v1242_v0 = vadd.f32 %v2753_v56, %v1241_v62 }
 0x287   : > { %v1889_v1 = vpop.f32.mrf.mxu0  ;;  %v1905_v2 = vpop.f32.mrf.mxu1 }
 0x288   : > { %1304 = vst [vmem:[%s2705_s10] sm:$0xff] %v1178_v63  ;;  %1320 = vst [vmem:[%s2705_s10 + $0x80] sm:$0xff] %v1242_v0  ;;  %v1189_v3 = vadd.f32 %v1889_v1, %v2753_v56  ;;  %v1253_v4 = vadd.f32 %v1905_v2, %v2753_v56 }
 0x289   : > { %v1180_v5 = vpop.f32.mrf.mxu0  ;;  %v1244_v6 = vpop.f32.mrf.mxu1 }
 0x28a   : > { %1307 = vst [vmem:[%s2705_s10 + $0x18] sm:$0xff] %v1189_v3  ;;  %1323 = vst [vmem:[%s2705_s10 + $0x98] sm:$0xff] %v1253_v4  ;;  %v1181_v7 = vadd.f32 %v2753_v56, %v1180_v5  ;;  %v1245_v8 = vadd.f32 %v2753_v56, %v1244_v6 }
 0x28b   : > { %v1892_v9 = vpop.f32.mrf.mxu0  ;;  %v1908_v10 = vpop.f32.mrf.mxu1 }
 0x28c   : > { %1305 = vst [vmem:[%s2705_s10 + $0x8] sm:$0xff] %v1181_v7  ;;  %1321 = vst [vmem:[%s2705_s10 + $0x88] sm:$0xff] %v1245_v8  ;;  %v1202_v11 = vadd.f32 %v1892_v9, %v2753_v56  ;;  %v1266_v12 = vadd.f32 %v1908_v10, %v2753_v56 }
 0x28d   : > { %v1193_v13 = vpop.f32.mrf.mxu0  ;;  %v1257_v14 = vpop.f32.mrf.mxu1 }
 0x28e   : > { %1310 = vst [vmem:[%s2705_s10 + $0x30] sm:$0xff] %v1202_v11  ;;  %1326 = vst [vmem:[%s2705_s10 + $0xb0] sm:$0xff] %v1266_v12  ;;  %v1194_v15 = vadd.f32 %v2753_v56, %v1193_v13  ;;  %v1258_v16 = vadd.f32 %v2753_v56, %v1257_v14 }
 0x28f   : > { %v1893_v17 = vpop.f32.mrf.mxu0  ;;  %v1909_v18 = vpop.f32.mrf.mxu1 }
 0x290   : > { %1308 = vst [vmem:[%s2705_s10 + $0x20] sm:$0xff] %v1194_v15  ;;  %1324 = vst [vmem:[%s2705_s10 + $0xa0] sm:$0xff] %v1258_v16  ;;  %v1205_v19 = vadd.f32 %v1893_v17, %v2753_v56  ;;  %v1269_v20 = vadd.f32 %v1909_v18, %v2753_v56 }
 0x291   : > { %v1196_v21 = vpop.f32.mrf.mxu0  ;;  %v1260_v22 = vpop.f32.mrf.mxu1 }
 0x292   : > { %1311 = vst [vmem:[%s2705_s10 + $0x38] sm:$0xff] %v1205_v19  ;;  %1327 = vst [vmem:[%s2705_s10 + $0xb8] sm:$0xff] %v1269_v20  ;;  %v1197_v23 = vadd.f32 %v2753_v56, %v1196_v21  ;;  %v1261_v24 = vadd.f32 %v2753_v56, %v1260_v22 }
 0x293   : > { %v1896_v25 = vpop.f32.mrf.mxu0  ;;  %v1912_v26 = vpop.f32.mrf.mxu1 }
 0x294   : > { %1309 = vst [vmem:[%s2705_s10 + $0x28] sm:$0xff] %v1197_v23  ;;  %1325 = vst [vmem:[%s2705_s10 + $0xa8] sm:$0xff] %v1261_v24  ;;  %v1218_v27 = vadd.f32 %v1896_v25, %v2753_v56  ;;  %v1282_v28 = vadd.f32 %v1912_v26, %v2753_v56 }
 0x295   : > { %v1209_v29 = vpop.f32.mrf.mxu0  ;;  %v1273_v30 = vpop.f32.mrf.mxu1 }
 0x296   : > { %1314 = vst [vmem:[%s2705_s10 + $0x50] sm:$0xff] %v1218_v27  ;;  %1330 = vst [vmem:[%s2705_s10 + $0xd0] sm:$0xff] %v1282_v28  ;;  %v1210_v31 = vadd.f32 %v2753_v56, %v1209_v29  ;;  %v1274_v32 = vadd.f32 %v2753_v56, %v1273_v30 }
 0x297   : > { %v1897_v33 = vpop.f32.mrf.mxu0  ;;  %v1913_v34 = vpop.f32.mrf.mxu1 }
 0x298   : > { %1312 = vst [vmem:[%s2705_s10 + $0x40] sm:$0xff] %v1210_v31  ;;  %1328 = vst [vmem:[%s2705_s10 + $0xc0] sm:$0xff] %v1274_v32  ;;  %v1221_v35 = vadd.f32 %v1897_v33, %v2753_v56  ;;  %v1285_v36 = vadd.f32 %v1913_v34, %v2753_v56 }
 0x299   : > { %v1212_v37 = vpop.f32.mrf.mxu0  ;;  %v1276_v38 = vpop.f32.mrf.mxu1 }
 0x29a   : > { %1315 = vst [vmem:[%s2705_s10 + $0x58] sm:$0xff] %v1221_v35  ;;  %1331 = vst [vmem:[%s2705_s10 + $0xd8] sm:$0xff] %v1285_v36  ;;  %v1213_v39 = vadd.f32 %v2753_v56, %v1212_v37  ;;  %v1277_v40 = vadd.f32 %v2753_v56, %v1276_v38 }
 0x29b   : > { %v1900_v41 = vpop.f32.mrf.mxu0  ;;  %v1916_v42 = vpop.f32.mrf.mxu1 }
 0x29c   : > { %1313 = vst [vmem:[%s2705_s10 + $0x48] sm:$0xff] %v1213_v39  ;;  %1329 = vst [vmem:[%s2705_s10 + $0xc8] sm:$0xff] %v1277_v40  ;;  %v1234_v43 = vadd.f32 %v1900_v41, %v2753_v56  ;;  %v1298_v44 = vadd.f32 %v1916_v42, %v2753_v56 }
 0x29d   : > { %v1225_v45 = vpop.f32.mrf.mxu0  ;;  %v1289_v46 = vpop.f32.mrf.mxu1 }
 0x29e   : > { %1318 = vst [vmem:[%s2705_s10 + $0x70] sm:$0xff] %v1234_v43  ;;  %1334 = vst [vmem:[%s2705_s10 + $0xf0] sm:$0xff] %v1298_v44  ;;  %v1226_v47 = vadd.f32 %v2753_v56, %v1225_v45  ;;  %v1290_v48 = vadd.f32 %v2753_v56, %v1289_v46 }
 0x29f   : > { %v1901_v49 = vpop.f32.mrf.mxu0  ;;  %v1917_v50 = vpop.f32.mrf.mxu1 }
 0x2a0   : > { %1316 = vst [vmem:[%s2705_s10 + $0x60] sm:$0xff] %v1226_v47  ;;  %1332 = vst [vmem:[%s2705_s10 + $0xe0] sm:$0xff] %v1290_v48  ;;  %v1237_v51 = vadd.f32 %v1901_v49, %v2753_v56  ;;  %v1301_v52 = vadd.f32 %v1917_v50, %v2753_v56 }
 0x2a1   : > { %v1228_v53 = vpop.f32.mrf.mxu0  ;;  %v1292_v54 = vpop.f32.mrf.mxu1 }
 0x2a2   : > { %1319 = vst [vmem:[%s2705_s10 + $0x78] sm:$0xff] %v1237_v51  ;;  %1335 = vst [vmem:[%s2705_s10 + $0xf8] sm:$0xff] %v1301_v52  ;;  %v1229_v55 = vadd.f32 %v2753_v56, %v1228_v53  ;;  %v1293_v57 = vadd.f32 %v2753_v56, %v1292_v54 }
 0x2a4   : > { %1317 = vst [vmem:[%s2705_s10 + $0x68] sm:$0xff] %v1229_v55  ;;  %1333 = vst [vmem:[%s2705_s10 + $0xe8] sm:$0xff] %v1293_v57 }
 0x2a5   : > { %2284 = shalt.err (!%p2281_p3)
}
 0x2a6   : > { %s2285_s1 = scalar_lea.hbm %s2819_s20, 4096  ;;  %s2289_s29 = scalar_lea.hbm %s2963_s5, 24576 }
 0x2a7   : > { %p2286_p2 = scmp.ne.s32.totalorder %s2819_s20, %s2285_s1  ;;  %p2290_p12 = scmp.lt.s32.totalorder %s2819_s20, %s2963_s5 }
 0x2a8   : > { %p2291_p11 = scmp.lt.s32.totalorder %s2289_s29, %s2285_s1 }
 0x2a9   : > { %p2287_p10 = pnand %p2286_p2, %p2964_p8 }
 0x2aa   : > { %p2292_p6 = por %p2291_p11, %p2290_p12 }
 0x2ab   : > { %p2288_p0 = pneg %p2287_p10 }
 0x2ad   : > { %p2293_p9 = pnand %p2292_p6, %p2288_p0 }
 0x2af   : > { %2296 = shalt.err (!%p2293_p9)
}
 0x2b0   : > { %s2434_s24 = smov 128   ;;  %s2435_s12 = smov 384  }
 0x2b1   : > { %s2436_s4 = smov 8  }
 0x2b2   : > { %1959 = dma.vmem_to_hbm [thread:$0]  (%p2964_p8), %s2821_s27, 4096, %s2819_s20, %s2831_s23, %s2434_s24, %s2435_s12, %s2436_s4  }
 0x2b3 PF: > { %p1979_p13 = scmp.ge.s32.totalorder %s2423_s28, 2  ;;  %s1367_s9 = sand.u32 1, %s2371_s15  }
 0x2b4   : > { %p2965_p4 = scmp.ne.s32.totalorder %s2947_s30, 0  ;;  %s1368_s2 = scalar_lea.sflag [#allocation5], %s1367_s9 }
 0x2b6   : > { %p1973_p7 = pnand %p1979_p13, %p2965_p4 }
 0x2b8   : > { %p1974_p1 = pneg %p1973_p7 }
 0x2ba   : > { %2366 = dma.done.wait (%p1974_p1), %s1368_s2, 4096  }
 0x2bb   : > { %2368 = vsyncadd (%p1974_p1), %s1368_s2, 4294963200  ;;  %s21_s28 = sadd.s32 1, %s2423_s28   ;;  %s2967_s18 = sld [smem:[#allocation14_spill]] }
 0x2bc   : > { %p2859_p5 = scmp.ge.s32.totalorder %s21_s28, 8   ;;  %s2968_s17 = sld [smem:[#allocation24_spill]] }
 0x2bd   : > { %s2969_s26 = sld [smem:[#allocation15_spill]]  ;;  %s2977_s15 = smov %s2375_s16 }
 0x2be   : > { %s2970_s20 = sld [smem:[#allocation25_spill]]  ;;  %s2981_s21 = smov %s2399_s22 }
 0x2bf   : > { %s2971_s27 = sld [smem:[#allocation16_spill]] }
 0x2c0   : > { %s2972_s23 = sld [smem:[#allocation23_spill]] }
 0x2c1   : > { %s2973_s24 = sld [smem:[#allocation19_spill]]  ;;  %s2978_s16 = smov %s2967_s18 }
 0x2c2   : > { %s2974_s25 = sld [smem:[#allocation20_spill]]  ;;  %s2979_s18 = smov %s2387_s19 }
 0x2c3   : > { %s2975_s30 = sld [smem:[#allocation21_spill]]  ;;  %s2980_s19 = smov %s2969_s26 }
 0x2c4   : > { %s2976_s13 = sld [smem:[#allocation22_spill]] }
 0x2c5   : > { %s2982_s22 = smov %s2971_s27 }
 0x2c6   :  { %20 = sbr.rel (!%p2859_p5) target bundleno = 17 (0x11), region = 103 }
 0x2c9   : > { %s2983_s26 = smov %s2975_s30 }
 0x2ca   : > { %s2984_s27 = smov %s2976_s13 }
 0x2cb   :  { %1373 = vsyncpa [#allocation4], 1 }
 0x2cc   :  { %1375 = vsyncpa [#allocation4 + $0x1], 1 }
 0x2cd   :  { %1376 = vsyncpa [#allocation7], 1 }
 0x2ce   :  { %1377 = vsyncpa [#allocation5], 1 }
 0x2cf   :  { %1379 = vsyncpa [#allocation5 + $0x1], 1 }

</bundles_post_ra>
